<compile_context>
chip_gen: v5e
topology: v5e:2x2
jax: 0.10.0
libtpu: 0.0.40
codegen_flags: <defaults>
</compile_context>

<pallas_src>
import jax
import jax.numpy as jnp
from jax.experimental import pallas as pl
from jax.experimental.pallas import tpu as pltpu


# ---------------- basis construction (plain JAX, cheap) ----------------

def compute_laplacian_power_basis(laplacian, degree):
    """Stack L^0, L^1, ..., L^(degree-1) along axis 0 -> (K, N, N) lane-dense slabs."""
    n = laplacian.shape[0]
    powers = [jnp.eye(n, dtype=laplacian.dtype)]
    for _ in range(degree - 1):
        powers.append(powers[-1] @ laplacian)
    return jnp.stack(powers, axis=0)


# ---------------- tiling / VMEM helpers ----------------

def _pick_row_tile(dim, n_cols, k, budget_bytes=8 << 20):
    """Row (sublane) tile: multiple of 8 dividing dim, or the full dim."""
    if dim % 8 != 0:
        return dim
    max_rows = max(8, (budget_bytes // (max(1, k) * n_cols * 4)) // 8 * 8)
    pref = min(256, max_rows)
    if dim <= pref:
        return dim
    t = pref
    while dim % t != 0:
        t -= 8
    return t


def _pick_col_tile(dim, n_rows, budget_bytes=8 << 20):
    """Column (lane) tile: multiple of 128 dividing dim, or the full dim."""
    if dim % 128 != 0:
        return dim
    max_cols = max(128, (budget_bytes // (n_rows * 4)) // 128 * 128)
    pref = min(512, max_cols)
    if dim <= pref:
        return dim
    t = pref
    while dim % t != 0:
        t -= 128
    return t


def _vmem_limit(*block_nbytes):
    # 2x for double-buffered pipelining + headroom; stay within v7x's 64 MiB VMEM.
    needed = 2 * sum(block_nbytes) + (4 << 20)
    return int(min(64 << 20, max(32 << 20, needed)))


# ---------------- Pallas kernels ----------------

def _fo_kernel(alpha_ref, lap_ref, fo_ref):
    """VPU scaled-add build of the filter operator in packed (F_out, N, N) layout.

    alpha_ref: (F_out, K) in SMEM (scalar reads)
    lap_ref  : (K, TR, N)  lane-dense row tile of the stacked Laplacian powers
    fo_ref   : (1, TR, N)  fo_packed[o, rows, :] = sum_k alpha[o, k] * L^k[rows, :]
    """
    o = pl.program_id(1)
    k_count = lap_ref.shape[0]
    acc = alpha_ref[o, 0] * lap_ref[0]
    for k in range(1, k_count):          # K is small & static -> unrolled VPU FMAs
        acc = acc + alpha_ref[o, k] * lap_ref[k]
    fo_ref[0] = acc


def _yz_kernel(xt_ref, fo_ref, mask_ref, wz_ref, y_ref, z_ref):
    """Lane-dense y / z computation for one (node-tile, filter) grid cell.

    xt_ref  : (B*F_in, N)    xt[b*F_in+c, n]      = x[b, n, c]
    fo_ref  : (1, N, TM)     fo_packed[o, n, m]   = filter_operator[n, m, o]
    mask_ref: (B*F_in, TM)   maskt[b*F_in+c, m]   = mask[b, m, c]
    wz_ref  : (B, B*F_in)    block-diag beta: wz[b, b*F_in+c] = beta[0, c]
    y_ref   : (1, B*F_in, TM)   masked y, packed
    z_ref   : (1, B, TM)        z, packed
    """
    yt = jnp.dot(xt_ref[...], fo_ref[0], preferred_element_type=jnp.float32)
    yt = yt * mask_ref[...]
    y_ref[0] = yt
    z_ref[0] = jnp.dot(wz_ref[...], yt, preferred_element_type=jnp.float32)


# ---------------- wrapper ----------------

def statistic_forward(x, mask, lap_stack, alpha_w, beta_w):
    """Returns (filter_operator, y, z) matching the reference forward.

    x         : (B, N, F_in)
    mask      : (B, N, F_in)
    lap_stack : (K, N, N)   stacked Laplacian powers L^0..L^(K-1)
    alpha_w   : (F_out, K)  Linear(K -> F_out), bias=False
    beta_w    : (1, F_in)   Linear(F_in -> 1), bias=False
    """
    B, N, f_in = x.shape
    K = lap_stack.shape[0]
    f_out = alpha_w.shape[0]
    bf = B * f_in

    # ---- kernel 1: packed filter operator fo_packed[o, n, m] (VPU, lane-dense) ----
    tr = _pick_row_tile(N, N, K)
    fo_packed = pl.pallas_call(
        _fo_kernel,
        grid=(N // tr, f_out),            # filter axis innermost -> lap tile reused
        out_shape=jax.ShapeDtypeStruct((f_out, N, N), jnp.float32),
        in_specs=[
            pl.BlockSpec(memory_space=pltpu.MemorySpace.SMEM),      # alpha (F_out, K)
            pl.BlockSpec((K, tr, N), lambda r, o: (0, r, 0)),       # lap_stack rows
        ],
        out_specs=pl.BlockSpec((1, tr, N), lambda r, o: (o, r, 0)),
        compiler_params=pltpu.CompilerParams(
            dimension_semantics=("parallel", "parallel"),
            vmem_limit_bytes=_vmem_limit(K * tr * N * 4, tr * N * 4),
        ),
    )(alpha_w, lap_stack)

    # ---- layout plumbing for kernel 2 (small arrays; lane axis = nodes) ----
    xt = x.transpose(0, 2, 1).reshape(bf, N)         # (B*F_in, N)
    maskt = mask.transpose(0, 2, 1).reshape(bf, N)   # (B*F_in, N)
    wz = jnp.kron(jnp.eye(B, dtype=beta_w.dtype), beta_w)   # (B, B*F_in)

    # ---- kernel 2: y and z, batch folded into LHS rows, tiled over nodes ----
    # TODO(synk): for extremely large N the (N, TM) fo block would need an extra
    #             contraction-dim grid axis + accumulator; not needed at these sizes.
    tm = _pick_col_tile(N, N)
    y_pk, z_pk = pl.pallas_call(
        _yz_kernel,
        grid=(N // tm, f_out),            # filter axis innermost -> xt/mask reused
        out_shape=(
            jax.ShapeDtypeStruct((f_out, bf, N), jnp.float32),
            jax.ShapeDtypeStruct((f_out, B, N), jnp.float32),
        ),
        in_specs=[
            pl.BlockSpec((bf, N), lambda mt, o: (0, 0)),          # xt (resident)
            pl.BlockSpec((1, N, tm), lambda mt, o: (o, 0, mt)),   # fo_packed tile
            pl.BlockSpec((bf, tm), lambda mt, o: (0, mt)),        # mask tile
            pl.BlockSpec((B, bf), lambda mt, o: (0, 0)),          # wz (resident)
        ],
        out_specs=(
            pl.BlockSpec((1, bf, tm), lambda mt, o: (o, 0, mt)),
            pl.BlockSpec((1, B, tm), lambda mt, o: (o, 0, mt)),
        ),
        compiler_params=pltpu.CompilerParams(
            dimension_semantics=("parallel", "parallel"),
            vmem_limit_bytes=_vmem_limit(
                bf * N * 4, N * tm * 4, bf * tm * 4, B * bf * 4,
                bf * tm * 4, B * tm * 4),
        ),
    )(xt, fo_packed, maskt, wz)

    # ---- layout plumbing back to the module's conventions ----
    filter_operator = fo_packed.transpose(1, 2, 0)               # (N, N, F_out)
    y = y_pk.reshape(f_out, B, f_in, N).transpose(1, 3, 0, 2)    # (B, N, F_out, F_in)
    z = z_pk.transpose(1, 2, 0)                                  # (B, N, F_out)
    return filter_operator, y, z


# ---------------- pure-JAX reference for verification ----------------

def statistic_reference(x, mask, lap_stack, alpha_w, beta_w):
    fo = jnp.einsum('knm,ok->nmo', lap_stack, alpha_w)
    y = jnp.einsum('bnc,nmo->bmoc', x, fo) * mask[:, :, None, :]
    z = jnp.einsum('bmoc,c->bmo', y, beta_w[0])
    return fo, y, z


if __name__ == "__main__":
    # small, module-consistent shapes
    B, N, F_IN, F_OUT, DEG = 2, 16, 4, 4, 3

    key = jax.random.PRNGKey(0)
    k_adj, k_x, k_mask, k_alpha, k_beta = jax.random.split(key, 5)

    # deterministic normalized graph Laplacian
    a = jax.random.uniform(k_adj, (N, N), dtype=jnp.float32)
    adj = ((a + a.T) * 0.5 > 0.5).astype(jnp.float32)
    adj = adj * (1.0 - jnp.eye(N, dtype=jnp.float32))
    deg = jnp.clip(adj.sum(axis=1), 1.0, None)
    d_inv_sqrt = 1.0 / jnp.sqrt(deg)
    laplacian = jnp.eye(N, dtype=jnp.float32) - d_inv_sqrt[:, None] * adj * d_inv_sqrt[None, :]

    lap_stack = compute_laplacian_power_basis(laplacian, DEG)     # (DEG, N, N)

    # deterministic "nn.Linear" weights (bias=False)
    alpha_w = 0.1 * jax.random.normal(k_alpha, (F_OUT, DEG), dtype=jnp.float32)  # Linear(DEG -> F_OUT)
    beta_w = 0.1 * jax.random.normal(k_beta, (1, F_IN), dtype=jnp.float32)       # Linear(F_IN -> 1)

    x = jax.random.normal(k_x, (B, N, F_IN), dtype=jnp.float32)
    mask = jax.random.bernoulli(k_mask, 0.7, (B, N, F_IN)).astype(jnp.float32)

    fo, y, z = statistic_forward(x, mask, lap_stack, alpha_w, beta_w)
    feature_vector = z.reshape(B, -1)                 # mirrors .view(batch_size, -1)
    jax.block_until_ready((fo, y, z, feature_vector))

    fo_r, y_r, z_r = statistic_reference(x, mask, lap_stack, alpha_w, beta_w)
    assert fo.shape == (N, N, F_OUT) and y.shape == (B, N, F_OUT, F_IN) and z.shape == (B, N, F_OUT)
    assert feature_vector.shape == (B, N * F_OUT)
    assert jnp.allclose(fo, fo_r, atol=1e-5, rtol=1e-5)
    assert jnp.allclose(y, y_r, atol=1e-5, rtol=1e-5)
    assert jnp.allclose(z, z_r, atol=1e-5, rtol=1e-5)

    print("KERNEL_OK")
</pallas_src>

<mosaic_0001>
module attributes {stable_mosaic.version = 11 : i64} {
  func.func @_fo_kernel(%arg0: i32, %arg1: i32, %arg2: memref<4x3xf32, #tpu.memory_space<smem>>, %arg3: memref<3x16x16xf32, #tpu.memory_space<vmem>>, %arg4: memref<1x16x16xf32, #tpu.memory_space<vmem>>) attributes {dimension_semantics = [#tpu.dimension_semantics<parallel>, #tpu.dimension_semantics<parallel>], iteration_bounds = array<i64: 1, 4>, scalar_prefetch = 0 : i64, scratch_operands = 0 : i64, tpu.core_type = #tpu.core_type<tc>, window_params = [{transform_indices = @transform_0, window_bounds = array<i64: 4, 3>}, {transform_indices = @transform_1, window_bounds = array<i64: 3, 16, 16>}, {transform_indices = @transform_2, window_bounds = array<i64: 1, 16, 16>}]} {
    %0 = arith.index_cast %arg1 : i32 to index
    %c0 = arith.constant 0 : index
    %1 = memref.load %arg2[%0, %c0] : memref<4x3xf32, #tpu.memory_space<smem>>
    %c0_0 = arith.constant 0 : index
    %c0_1 = arith.constant 0 : index
    %c0_2 = arith.constant 0 : index
    %2 = vector.load %arg3[%c0_0, %c0_1, %c0_2] : memref<3x16x16xf32, #tpu.memory_space<vmem>>, vector<1x16x16xf32>
    %3 = vector.shape_cast %2 : vector<1x16x16xf32> to vector<16x16xf32>
    %4 = vector.broadcast %1 : f32 to vector<16x16xf32>
    %5 = arith.mulf %4, %3 : vector<16x16xf32>
    %6 = arith.index_cast %arg1 : i32 to index
    %c1 = arith.constant 1 : index
    %7 = memref.load %arg2[%6, %c1] : memref<4x3xf32, #tpu.memory_space<smem>>
    %c1_3 = arith.constant 1 : index
    %c0_4 = arith.constant 0 : index
    %c0_5 = arith.constant 0 : index
    %8 = vector.load %arg3[%c1_3, %c0_4, %c0_5] : memref<3x16x16xf32, #tpu.memory_space<vmem>>, vector<1x16x16xf32>
    %9 = vector.shape_cast %8 : vector<1x16x16xf32> to vector<16x16xf32>
    %10 = vector.broadcast %7 : f32 to vector<16x16xf32>
    %11 = arith.mulf %10, %9 : vector<16x16xf32>
    %12 = arith.addf %5, %11 : vector<16x16xf32>
    %13 = arith.index_cast %arg1 : i32 to index
    %c2 = arith.constant 2 : index
    %14 = memref.load %arg2[%13, %c2] : memref<4x3xf32, #tpu.memory_space<smem>>
    %c2_6 = arith.constant 2 : index
    %c0_7 = arith.constant 0 : index
    %c0_8 = arith.constant 0 : index
    %15 = vector.load %arg3[%c2_6, %c0_7, %c0_8] : memref<3x16x16xf32, #tpu.memory_space<vmem>>, vector<1x16x16xf32>
    %16 = vector.shape_cast %15 : vector<1x16x16xf32> to vector<16x16xf32>
    %17 = vector.broadcast %14 : f32 to vector<16x16xf32>
    %18 = arith.mulf %17, %16 : vector<16x16xf32>
    %19 = arith.addf %12, %18 : vector<16x16xf32>
    %c0_9 = arith.constant 0 : index
    %c0_10 = arith.constant 0 : index
    %c0_11 = arith.constant 0 : index
    %20 = vector.load %arg4[%c0_9, %c0_10, %c0_11] : memref<1x16x16xf32, #tpu.memory_space<vmem>>, vector<1x16x16xf32>
    %21 = vector.shape_cast %20 : vector<1x16x16xf32> to vector<16x16xf32>
    %22 = vector.shape_cast %19 : vector<16x16xf32> to vector<1x16x16xf32>
    tpu.vector_store %arg4[%c0_9, %c0_10, %c0_11], %22 {strides = array<i32>} : memref<1x16x16xf32, #tpu.memory_space<vmem>>, vector<1x16x16xf32>,
    return
  }
  func.func @transform_0(%arg0: i32, %arg1: i32) -> (i32, i32) {
    %c0_i32 = arith.constant 0 : i32
    %c0_i32_0 = arith.constant 0 : i32
    %c0_i32_1 = arith.constant 0 : i32
    return %c0_i32, %c0_i32_0 : i32, i32
  }
  func.func @transform_1(%arg0: i32, %arg1: i32) -> (i32, i32, i32) {
    %c0_i32 = arith.constant 0 : i32
    %c0_i32_0 = arith.constant 0 : i32
    %c0_i32_1 = arith.constant 0 : i32
    return %c0_i32, %arg0, %c0_i32_0 : i32, i32, i32
  }
  func.func @transform_2(%arg0: i32, %arg1: i32) -> (i32, i32, i32) {
    %c0_i32 = arith.constant 0 : i32
    %c0_i32_0 = arith.constant 0 : i32
    return %arg1, %arg0, %c0_i32 : i32, i32, i32
  }
}

</mosaic_0001>

<bundles_post_ra>
// kernel: tpu_custom_call.1
= control target key start
LH: loop header
LB: loop body
LE: loop exit
PB: predicated region body
PF: predicated region fallthrough
CT: control target
= control target key end

     0   :  { %7 = vsyncpa [#allocation5], 0  ;;  %s687_s0 = inlined_call_operand.hbm [shape: f32[4,3], index: 0, kind: input, shape index: {}]   ;;  %s688_s1 = inlined_call_operand.hbm [shape: f32[3,16,16], index: 1, kind: input, shape index: {}]   ;;  %s689_s2 = inlined_call_operand.hbm [shape: f32[4,16,16], index: 2, kind: output, shape index: {}]  }
   0x1   :  { %8 = vsyncpa [#allocation3], 0 }
   0x2   :  { %9 = vsyncpa [#allocation4], 0 }
   0x3   :  { %11 = vsyncpa [#allocation4 + $0x1], 0  ;;  %s562_s9 = smov 0   ;;  %s564_s10 = smov 0  }
   0x4   :  { %s566_s11 = smov 0   ;;  %s568_s12 = smov 0  }
   0x5   :  { %s570_s13 = smov 0   ;;  %s572_s14 = smov 0  }
   0x6 LB: > { %s312_s15 = sadd.s32 4294967295, %s539_s14   ;;  %s313_s16 = sadd.s32 4294967294, %s539_s14   ;;  %s539_s14 = sphi %s572_s14, %s17_s14   ;;  %s535_s13 = sphi %s570_s13, %s698_s13   ;;  %s531_s12 = sphi %s568_s12, %s697_s12   ;;  %s527_s11 = sphi %s566_s11, %s696_s11   ;;  %s523_s10 = sphi %s564_s10, %s695_s10   ;;  %s519_s9 = sphi %s562_s9, %s694_s9  }
   0x7   : > { %s26_s17 = sadd.s32 1, %s535_s13  ;;  %s85_s18 = sadd.s32 1, %s527_s11 }
   0x8   : > { %p27_p0 = scmp.ge.s32.totalorder %s26_s17, 4  ;;  %p95_p1 = scmp.ne.s32.totalorder %s527_s11, %s523_s10 }
   0x9   : > { %p96_p2 = scmp.eq.s32.totalorder %s312_s15, 3  ;;  %p101_p3 = scmp.ne.s32.totalorder %s523_s10, %s519_s9 }
   0xa   : > { %s700_s17 = smov (%p27_p0, %s26_s17), 0  ;;  %p102_p5 = scmp.eq.s32.totalorder %s313_s16, 3 }
   0xb   : > { %p602_p4 = por %p96_p2, %p95_p1  ;;  %s80_s20 = ssub.s32 %s535_s13, %s700_s17 }
   0xc   : > { %p314_p6 = scmp.ge.s32.totalorder %s539_s14, 1  ;;  %p83_p7 = scmp.eq.s32.totalorder %s80_s20, 0 }
   0xd   : > { %p609_p8 = por %p102_p5, %p101_p3  ;;  %p109_p9 = scmp.lt.s32.totalorder %s539_s14, 5 }
   0xe   : > { %s615_s22 = scalar_select %p83_p7, %s527_s11, %s85_s18  }
   0xf   : > { %p617_p10 = pnand %p314_p6, %p109_p9  ;;  %p621_p11 = scmp.eq.s32.totalorder %s312_s15, 0 }
  0x10   : > { %s121_s27 = sshll.u32 %s687_s0, 4  ;;  %s133_s30 = sshll.u32 %s688_s1, 4  ;;  %s122_s27 = int_to_ptr.hbm [resolvable:$true] %s121_s27  ;;  %s134_s30 = int_to_ptr.hbm [resolvable:$true] %s133_s30 }
  0x11   : > { %p338_p12 = pneg %p617_p10  ;;  %s541_s3 = smov [#allocation6]  }
  0x12   : > { %s135_s4 = sshll.u32 %s541_s3, 4  ;;  %s542_s5 = smov [#allocation2]   ;;  %s136_s4 = int_to_ptr.vmem [resolvable:$true] %s135_s4 }
  0x13   : > { %p339_p13 = pnand %p621_p11, %p338_p12  ;;  %s543_s6 = smov 128  }
  0x14   : > { %s544_s7 = smov 8   ;;  %151 = sbr.rel (%p617_p10) target bundleno = 50 (0x32), region = 28 }
  0x15   : > { %341 = dma.hbm_to_smem (!%p339_p13), %s122_s27, 64, %s542_s5, [#allocation5]  }
  0x16   : > { %344 = dma.hbm_to_vmem [thread:$0]  (!%p339_p13), %s134_s30, 768, %s136_s4, [#allocation3], %s543_s6, %s543_s6, %s544_s7  }
  0x19   : > { %506 = dma.done.wait (%p621_p11), [#allocation5], 64  }
  0x1a   : > { %508 = vsyncadd (%p621_p11), [#allocation5], 4294967232 }
  0x1b   : > { %510 = dma.done.wait (%p621_p11), [#allocation3], 768  }
  0x1c   : > { %512 = vsyncadd (%p621_p11), [#allocation3], 4294966528 }
  0x1d   : > { %163 = sfence }
  0x1e   : > { %s321_s8 = sshll.u32 %s531_s12, 7  ;;  %s172_s16 = sand.u32 1, %s523_s10   ;;  %v179_v0 = vld [vmem:[#allocation6] sm:$0xff]  ;;  %v180_v1 = vld [vmem:[#allocation6 + $0x8] sm:$0xff]  ;;  %v187_v3 = vld [vmem:[#allocation6 + $0x10] sm:$0xff]  ;;  %vm204_vm0 = vcmask 130048  }
  0x1f   : > { %s178_s15 = sld [smem:[#allocation2 + %s321_s8]]  ;;  %s184_s18 = sadd.s32 1, %s321_s8  ;;  %v188_v4 = vld [vmem:[#allocation6 + $0x18] sm:$0xff]  ;;  %v197_v6 = vld [vmem:[#allocation6 + $0x20] sm:$0xff]  ;;  %v198_v8 = vld [vmem:[#allocation6 + $0x28] sm:$0xff] }
  0x20   : > { %s185_s20 = sld [smem:[#allocation2 + %s184_s18]]  ;;  %s194_s23 = sadd.s32 2, %s321_s8 }
  0x21   : > { %s195_s25 = sld [smem:[#allocation2 + %s194_s23]]  ;;  %s320_s26 = sshll.u32 %s172_s16, 4 }
  0x22   : > { %s327_s27 = sshll.u32 %s531_s12, 4  ;;  %s174_s30 = scalar_lea.vmem [#allocation7], %s320_s26 }
  0x23   : > { %s221_s29 = scalar_lea.hbm %s689_s2, %s327_s27  ;;  %s222_s3 = sshll.u32 %s174_s30, 4  ;;  %s223_s3 = int_to_ptr.vmem [resolvable:$true] %s222_s3 }
  0x24   : > { %s224_s12 = sshll.u32 %s221_s29, 4  ;;  %s208_s4 = scalar_lea.sflag [#allocation4], %s172_s16  ;;  %s225_s12 = int_to_ptr.hbm [resolvable:$true] %s224_s12 }
  0x25   : > { %v181_v2 = vstv %s178_s15  ;;  %s467_s5 = sshra.s32 %s225_s12, 4  ;;  %s473_s15 = scalar_lea.hbm %s689_s2, 64  ;;  %s468_s5 = int_to_ptr.hbm [resolvable:$true] %s467_s5 }
  0x26   : > { %v182_v5 = vmul.f32 %v181_v2, %v179_v0  ;;  %v183_v7 = vmul.f32 %v181_v2, %v180_v1  ;;  %v189_v9 = vstv %s185_s20  ;;  %s469_s6 = scalar_lea.hbm %s468_s5, 16  ;;  %p474_p3 = scmp.lt.s32.totalorder %s468_s5, %s689_s2 }
  0x27   : > { %v190_v10 = vmul.f32 %v189_v9, %v187_v3  ;;  %v199_v11 = vstv %s195_s25  ;;  %v191_v12 = vmul.f32 %v189_v9, %v188_v4  ;;  %p470_p0 = scmp.ne.s32.totalorder %s468_s5, %s469_s6  ;;  %p475_p5 = scmp.lt.s32.totalorder %s473_s15, %s469_s6 }
  0x28   : > { %v200_v13 = vmul.f32 %v199_v11, %v197_v6  ;;  %v201_v14 = vmul.f32 %v199_v11, %v198_v8 }
  0x29   : > { %v192_v15 = vadd.f32 %v190_v10, %v182_v5  ;;  %v193_v16 = vadd.f32 %v191_v12, %v183_v7  ;;  %p471_p1 = pnand %p470_p0, %p602_p4  ;;  %p476_p6 = por %p475_p5, %p474_p3 }
  0x2b   : > { %v202_v17 = vadd.f32 %v200_v13, %v192_v15  ;;  %v203_v18 = vadd.f32 %v201_v14, %v193_v16  ;;  %p472_p2 = pneg %p471_p1 }
  0x2d   : > { %205 = vst.msk [vmem:[%s174_s30] sm:$0xff] %vm204_vm0, %v202_v17  ;;  %p477_p7 = pnand %p476_p6, %p472_p2 }
  0x2e   : > { %206 = vst.msk [vmem:[%s174_s30 + $0x8] sm:$0xff] %vm204_vm0, %v203_v18 }
  0x2f   : > { %480 = shalt.err (!%p477_p7)
}
  0x30   : > { %s545_s16 = smov 128   ;;  %s546_s23 = smov 8  }
  0x31   : > { %336 = dma.vmem_to_hbm [thread:$0]  (%p602_p4), %s223_s3, 256, %s225_s12, %s208_s4, %s545_s16, %s545_s16, %s546_s23  }
  0x32 PF: > { %p353_p9 = scmp.ge.s32.totalorder %s539_s14, 2  ;;  %s239_s25 = sand.u32 1, %s519_s9  }
  0x33   : > { %s240_s26 = scalar_lea.sflag [#allocation4], %s239_s25 }
  0x34   : > { %p346_p10 = pnand %p353_p9, %p609_p8 }
  0x36   : > { %p347_p11 = pneg %p346_p10 }
  0x38   : > { %514 = dma.done.wait (%p347_p11), %s240_s26, 256  }
  0x39   : > { %516 = vsyncadd (%p347_p11), %s240_s26, 4294967040  ;;  %s17_s14 = sadd.s32 1, %s539_s14   ;;  %s694_s9 = smov %s523_s10 }
  0x3a   : > { %p14_p12 = scmp.ge.s32.totalorder %s17_s14, 6   ;;  %s695_s10 = smov %s527_s11 }
  0x3b   : > { %s696_s11 = smov %s615_s22  ;;  %s697_s12 = smov %s535_s13 }
  0x3c   : > { %s698_s13 = smov %s700_s17  ;;  %16 = sbr.rel (!%p14_p12) target bundleno = 6 (0x6), region = 73 }
  0x41   :  { %246 = vsyncpa [#allocation3], 1 }
  0x42   :  { %248 = vsyncpa [#allocation3 + $0x1], 1 }
  0x43   :  { %249 = vsyncpa [#allocation4], 1 }
  0x44   :  { %251 = vsyncpa [#allocation4 + $0x1], 1 }
  0x45   :  { %252 = vsyncpa [#allocation5], 1 }
  0x46   :  { %254 = vsyncpa [#allocation5 + $0x1], 1 }

</bundles_post_ra>
